<compile_context>
chip_gen: v6e
topology: v6e:2x2x1
jax: 0.10.0
libtpu: 0.0.40
codegen_flags: <defaults>
</compile_context>

<pallas_src>
import jax
import jax.numpy as jnp
from jax.experimental import pallas as pl
from jax.experimental.pallas import tpu as pltpu

_LANE = 128     # vreg lane width
_SUBLANE = 8    # vreg sublane count


def _round_up(n, m):
    return (n + m - 1) // m * m


def _cdiv(a, b):
    return (a + b - 1) // b


def _mlp_kernel(x_ref, w1_ref, b1_ref, w2_ref, b2_ref, o_ref):
    """Fused dense1 -> ReLU -> dense2 on one batch tile.

    Both matmuls accumulate in f32 on the MXU; the bias-add / ReLU epilogue
    stays f32 on the VPU (correct fast path on v5e, which has no bf16 VPU).
    Activations are cast to the weight dtype *inside* the kernel so a bf16
    weight path never costs an extra HBM pass over x."""
    x = x_ref[...]
    w1 = w1_ref[...]
    if x.dtype != w1.dtype:
        x = x.astype(w1.dtype)
    h = jnp.dot(x, w1, preferred_element_type=jnp.float32)
    h = jnp.maximum(h + b1_ref[...], 0.0)
    w2 = w2_ref[...]
    y = jnp.dot(h.astype(w2.dtype), w2, preferred_element_type=jnp.float32)
    o_ref[...] = (y + b2_ref[...]).astype(o_ref.dtype)


def prepare_class_token_mlp_params(w1, b1, w2, b2, *, operand_dtype=jnp.bfloat16):
    """One-time parameter prep (hoisted out of the per-call hot path).

    Pads only the hidden (lane) dim of the weights to a multiple of 128 and
    casts the weights to the MXU operand dtype. Zero padding is exact: padded
    h columns are relu(0 + 0) = 0 and the matching w2 rows are 0, so they
    contribute nothing. Biases stay f32 (added to the f32 accumulator)."""
    D, H = w1.shape
    Hw, O = w2.shape
    assert Hw == H and b1.shape == (H,) and b2.shape == (O,)
    Hp = _round_up(H, _LANE)
    if operand_dtype is not None:
        w1 = w1.astype(operand_dtype)
        w2 = w2.astype(operand_dtype)
    w1_p = jnp.pad(w1, ((0, 0), (0, Hp - H)))
    b1_p = jnp.pad(b1.astype(jnp.float32), (0, Hp - H)).reshape(1, Hp)
    w2_p = jnp.pad(w2, ((0, Hp - H), (0, 0)))
    b2_p = b2.astype(jnp.float32).reshape(1, O)
    # TODO(synk): optional v7x fp8 weight path (fp8 w1/w2, bf16 x, f32 acc) with
    # an in-kernel fp8->bf16 upcast before the MXU; never route int8 to the MXU.
    return (w1_p, b1_p, w2_p, b2_p)


def class_token_mlp(x, params, *, block_b=1024):
    """x: (B, num_hiddens), unpadded.  params: from prepare_class_token_mlp_params."""
    w1_p, b1_p, w2_p, b2_p = params
    assert x.ndim == 2
    B, D = x.shape
    Dw, Hp = w1_p.shape
    Hw, O = w2_p.shape
    assert Dw == D and Hw == Hp and b1_p.shape == (1, Hp) and b2_p.shape == (1, O)

    out_dtype = x.dtype
    x_bytes = B * D * x.dtype.itemsize
    out_bytes = B * O * jnp.dtype(out_dtype).itemsize
    w_bytes = sum(int(a.size) * a.dtype.itemsize for a in params)

    # Advisory estimate based on what is actually DMA'd: x and the output are
    # unpadded in HBM; only the weights carry the (one-time) Hp padding.
    cost = pl.CostEstimate(
        flops=2 * B * (D * Hp + Hp * O),
        transcendentals=0,
        bytes_accessed=x_bytes + w_bytes + out_bytes,
    )

    block_b = max(_SUBLANE, _round_up(block_b, _SUBLANE))

    if B <= block_b:
        # Small batch (the class-token case): single-shot kernel with every
        # operand fully VMEM-resident — no grid, no double-buffering, no
        # pipeline prologue/epilogue.
        interm = B * Hp * 4 + B * (D + O) * 4
        vmem_limit = int(min(48 << 20,
                             max(8 << 20,
                                 2 * (x_bytes + w_bytes + out_bytes + interm))))
        return pl.pallas_call(
            _mlp_kernel,
            out_shape=jax.ShapeDtypeStruct((B, O), out_dtype),
            in_specs=[pl.BlockSpec(memory_space=pltpu.MemorySpace.VMEM)] * 5,
            out_specs=pl.BlockSpec(memory_space=pltpu.MemorySpace.VMEM),
            compiler_params=pltpu.CompilerParams(vmem_limit_bytes=vmem_limit),
            cost_estimate=cost,
        )(x, w1_p, b1_p, w2_p, b2_p)

    # -------- Large batch: tile the M (batch) axis only. --------
    n_tiles = _cdiv(B, block_b)
    # v7x megacore: prefer an even tile count so 'parallel' sharding across its
    # 2 TensorCores stays balanced on the last wave (no effect on v5e/v6e).
    if n_tiles > 1 and n_tiles % 2 == 1:
        bb = _round_up(_cdiv(B, n_tiles + 1), _SUBLANE)
        if _cdiv(B, bb) % 2 == 0:
            block_b = bb
            n_tiles = _cdiv(B, bb)

    # Per-tile VMEM budget: double-buffered x/out streams + resident weights
    # (x2 for default double-buffering) + f32 intermediates, with 2x headroom.
    # Stays well inside v7x's 64 MiB/TC even at block_b = 4096.
    tile_in = block_b * D * x.dtype.itemsize
    tile_out = block_b * O * jnp.dtype(out_dtype).itemsize
    tile_interm = block_b * Hp * 4 + block_b * (D + O) * 4
    vmem_limit = int(min(48 << 20,
                         max(8 << 20,
                             2 * (2 * (tile_in + tile_out)
                                  + 2 * w_bytes + tile_interm))))

    # Constant-index weight/bias blocks stay resident across the grid. For
    # ViT-scale weights (>1 MiB) request single-buffering to halve their VMEM
    # footprint; for tiny class-token weights the default (~100 KB extra) is fine.
    single_buffer = w_bytes >= (1 << 20)

    def _const_spec(shape):
        if single_buffer:
            return pl.BlockSpec(shape, lambda i: (0, 0),
                                pipeline_mode=pl.Buffered(1))
        return pl.BlockSpec(shape, lambda i: (0, 0))

    # x / out keep their true (unpadded) last dim: full-extent block dims are
    # legal and avoid padding x D->128 and the padded-output + slice passes in
    # HBM; Mosaic pads K=D and N=O in-vreg for the MXU.  A ragged final batch
    # tile is handled by Pallas (OOB input rows unused, OOB output writes
    # dropped) and each output row depends only on its own input row.
    return pl.pallas_call(
        _mlp_kernel,
        out_shape=jax.ShapeDtypeStruct((B, O), out_dtype),
        grid=(n_tiles,),
        in_specs=[
            pl.BlockSpec((block_b, D), lambda i: (i, 0)),   # streamed x tiles
            _const_spec((D, Hp)),                           # resident weights
            _const_spec((1, Hp)),
            _const_spec((Hp, O)),
            _const_spec((1, O)),
        ],
        out_specs=pl.BlockSpec((block_b, O), lambda i: (i, 0)),
        compiler_params=pltpu.CompilerParams(
            dimension_semantics=("parallel",),
            vmem_limit_bytes=vmem_limit),
        cost_estimate=cost,
    )(x, w1_p, b1_p, w2_p, b2_p)


def _reference(x, w1, b1, w2, b2):
    h = jnp.maximum(x @ w1 + b1, 0.0)
    return h @ w2 + b2


if __name__ == "__main__":
    # Small shapes consistent with the module (class-token MLP).
    batch = 8
    num_hiddens = 32
    mlp_hiddens = 64
    mlp_outs = 16

    key = jax.random.PRNGKey(0)
    kx, kw1, kb1, kw2, kb2, kx2 = jax.random.split(key, 6)

    x = jax.random.normal(kx, (batch, num_hiddens), jnp.float32)
    # Deterministic synthetic parameter init (shapes follow nn.Linear).
    w1 = jax.random.normal(kw1, (num_hiddens, mlp_hiddens), jnp.float32) * 0.1
    b1 = jax.random.normal(kb1, (mlp_hiddens,), jnp.float32) * 0.1
    w2 = jax.random.normal(kw2, (mlp_hiddens, mlp_outs), jnp.float32) * 0.1
    b2 = jax.random.normal(kb2, (mlp_outs,), jnp.float32) * 0.1

    # One-time (hoisted) parameter prep, in both precisions.
    params_f32 = prepare_class_token_mlp_params(w1, b1, w2, b2, operand_dtype=None)
    params_bf16 = prepare_class_token_mlp_params(w1, b1, w2, b2)   # default bf16

    # 1) f32 exact, small-batch single-shot path.
    out = jax.block_until_ready(class_token_mlp(x, params_f32))
    ref = _reference(x, w1, b1, w2, b2)
    assert out.shape == (batch, mlp_outs)
    assert jnp.allclose(out, ref, atol=1e-4, rtol=1e-4), "f32 mismatch vs reference"

    # 2) f32, tiled 'parallel'-batch path (block_b=8 -> 4 even grid steps).
    x_big = jax.random.normal(kx2, (32, num_hiddens), jnp.float32)
    out_big = jax.block_until_ready(class_token_mlp(x_big, params_f32, block_b=8))
    ref_big = _reference(x_big, w1, b1, w2, b2)
    assert out_big.shape == (32, mlp_outs)
    assert jnp.allclose(out_big, ref_big, atol=1e-4, rtol=1e-4), "tiled mismatch"

    # 3) default bf16 operands / f32 accumulation (MXU-native on v5e/v6e),
    #    compared against a bf16-rounded reference.
    out_bf = jax.block_until_ready(class_token_mlp(x, params_bf16))
    xb = x.astype(jnp.bfloat16).astype(jnp.float32)
    w1b = w1.astype(jnp.bfloat16).astype(jnp.float32)
    w2b = w2.astype(jnp.bfloat16).astype(jnp.float32)
    hb = jnp.maximum(xb @ w1b + b1, 0.0).astype(jnp.bfloat16).astype(jnp.float32)
    ref_bf = hb @ w2b + b2
    assert jnp.allclose(out_bf, ref_bf, atol=5e-2, rtol=5e-2), "bf16 mismatch"

    print("KERNEL_OK")
</pallas_src>

<mosaic_0001>
module attributes {stable_mosaic.version = 11 : i64} {
  func.func @_mlp_kernel(%arg0: memref<8x32xf32, #tpu.memory_space<vmem>>, %arg1: memref<32x128xf32, #tpu.memory_space<vmem>>, %arg2: memref<1x128xf32, #tpu.memory_space<vmem>>, %arg3: memref<128x16xf32, #tpu.memory_space<vmem>>, %arg4: memref<1x16xf32, #tpu.memory_space<vmem>>, %arg5: memref<8x16xf32, #tpu.memory_space<vmem>>) attributes {dimension_semantics = [], scalar_prefetch = 0 : i64, scratch_operands = 0 : i64, tpu.core_type = #tpu.core_type<tc>} {
    %c0 = arith.constant 0 : index
    %c0_0 = arith.constant 0 : index
    %0 = vector.load %arg0[%c0, %c0_0] : memref<8x32xf32, #tpu.memory_space<vmem>>, vector<8x32xf32>
    %c0_1 = arith.constant 0 : index
    %c0_2 = arith.constant 0 : index
    %1 = vector.load %arg1[%c0_1, %c0_2] : memref<32x128xf32, #tpu.memory_space<vmem>>, vector<32x128xf32>
    %cst = arith.constant dense<0.000000e+00> : vector<8x128xf32>
    %2 = tpu.matmul %0, %1, %cst {dimension_numbers = #tpu.dot_dimension_numbers<[1], [0], [0], [1], [0, 0, 1, 1], [], []>} : vector<8x32xf32>, vector<32x128xf32>, vector<8x128xf32> -> vector<8x128xf32>
    %c0_3 = arith.constant 0 : index
    %c0_4 = arith.constant 0 : index
    %3 = vector.load %arg2[%c0_3, %c0_4] : memref<1x128xf32, #tpu.memory_space<vmem>>, vector<1x128xf32>
    %4 = vector.broadcast %3 : vector<1x128xf32> to vector<8x128xf32>
    %5 = arith.addf %2, %4 : vector<8x128xf32>
    %cst_5 = arith.constant 0.000000e+00 : f32
    %6 = vector.broadcast %cst_5 : f32 to vector<8x128xf32>
    %7 = arith.maximumf %5, %6 : vector<8x128xf32>
    %c0_6 = arith.constant 0 : index
    %c0_7 = arith.constant 0 : index
    %8 = vector.load %arg3[%c0_6, %c0_7] : memref<128x16xf32, #tpu.memory_space<vmem>>, vector<128x16xf32>
    %cst_8 = arith.constant dense<0.000000e+00> : vector<8x16xf32>
    %9 = tpu.matmul %7, %8, %cst_8 {dimension_numbers = #tpu.dot_dimension_numbers<[1], [0], [0], [1], [0, 0, 1, 1], [], []>} : vector<8x128xf32>, vector<128x16xf32>, vector<8x16xf32> -> vector<8x16xf32>
    %c0_9 = arith.constant 0 : index
    %c0_10 = arith.constant 0 : index
    %10 = vector.load %arg4[%c0_9, %c0_10] : memref<1x16xf32, #tpu.memory_space<vmem>>, vector<1x16xf32>
    %11 = vector.broadcast %10 : vector<1x16xf32> to vector<8x16xf32>
    %12 = arith.addf %9, %11 : vector<8x16xf32>
    %c0_11 = arith.constant 0 : index
    %c0_12 = arith.constant 0 : index
    %13 = vector.load %arg5[%c0_11, %c0_12] : memref<8x16xf32, #tpu.memory_space<vmem>>, vector<8x16xf32>
    tpu.vector_store %arg5[%c0_11, %c0_12], %12 {strides = array<i32>} : memref<8x16xf32, #tpu.memory_space<vmem>>, vector<8x16xf32>,
    return
  }
}

</mosaic_0001>

<bundles_post_ra>
// kernel: tpu_custom_call.1
= control target key start
LH: loop header
LB: loop body
LE: loop exit
PB: predicated region body
PF: predicated region fallthrough
CT: control target
= control target key end

     0   :  { %v313_v1 = vmov 0.0   ;;  %vm314_vm0 = vmmov 0   ;;  %vm33_vm1 = vcmask 261120   ;;  %s442_s0 = inlined_call_operand.vmem [shape: f32[8,32], index: 0, kind: input, shape index: {}]   ;;  %s443_s1 = inlined_call_operand.vmem [shape: f32[32,128], index: 1, kind: input, shape index: {}]   ;;  %s444_s2 = inlined_call_operand.vmem [shape: f32[1,128], index: 2, kind: input, shape index: {}]   ;;  %s445_s3 = inlined_call_operand.vmem [shape: f32[128,16], index: 3, kind: input, shape index: {}]   ;;  %s446_s4 = inlined_call_operand.vmem [shape: f32[1,16], index: 4, kind: input, shape index: {}]   ;;  %s447_s5 = inlined_call_operand.hbm [shape: f32[8,16], index: 5, kind: output, shape index: {}]  }
   0x1   :  { %v25_v0 = vld [vmem:[%s443_s1 + $0x18] sm:$0xff]  ;;  %242 = vmatprep.subr.mxu0 %v313_v1  ;;  %v24_v2 = vld [vmem:[%s443_s1 + $0x10] sm:$0xff]  ;;  %250 = vmatprep.mubr.msk.f32.mxu0 %vm314_vm0, %v313_v1  ;;  %v23_v5 = vld [vmem:[%s443_s1 + $0x8] sm:$0xff] }
   0x2   :  { %v123_v3 = vld [vmem:[%s445_s3 + $0x78] sm:$0xff]  ;;  %243 = vmatpush3.msra.mxu0 %v25_v0  ;;  %253 = vmatprep.subr.mxu1 %v313_v1  ;;  %v122_v4 = vld [vmem:[%s445_s3 + $0x70] sm:$0xff]  ;;  %v121_v6 = vld [vmem:[%s445_s3 + $0x68] sm:$0xff] }
   0x3   :  { %244 = vmatprep.subr.mxu0 %v313_v1  ;;  %254 = vmatpush3.msra.mxu1 %v123_v3  ;;  %v22_v7 = vld [vmem:[%s443_s1] sm:$0xff] }
   0x4   :  { %245 = vmatpush3.msra.mxu0 %v24_v2  ;;  %255 = vmatprep.subr.mxu1 %v313_v1  ;;  %v21_v8 = vld [vmem:[%s442_s0] sm:$0xff] }
   0x5   :  { %246 = vmatprep.subr.mxu0 %v313_v1  ;;  %256 = vmatpush3.msra.mxu1 %v122_v4  ;;  %v120_v9 = vld [vmem:[%s445_s3 + $0x60] sm:$0xff] }
   0x6   :  { %247 = vmatpush3.msra.mxu0 %v23_v5  ;;  %257 = vmatprep.subr.mxu1 %v313_v1 }
   0x7   :  { %10 = vsyncpa [#allocation3], 0  ;;  %248 = vmatprep.subr.mxu0 %v313_v1  ;;  %258 = vmatpush3.msra.mxu1 %v121_v6  ;;  %v119_v10 = vld [vmem:[%s445_s3 + $0x58] sm:$0xff]  ;;  %v118_v11 = vld [vmem:[%s445_s3 + $0x50] sm:$0xff]  ;;  %s315_s11 = smov [#allocation2]   ;;  %vm201_vm2 = vcmask 130048  }
   0x8   :  { %249 = vmatpush3.msra.mxu0 %v22_v7  ;;  %259 = vmatprep.subr.mxu1 %v313_v1  ;;  %v117_v12 = vld [vmem:[%s445_s3 + $0x48] sm:$0xff]  ;;  %v116_v13 = vld [vmem:[%s445_s3 + $0x40] sm:$0xff]  ;;  %v115_v14 = vld [vmem:[%s445_s3 + $0x38] sm:$0xff]  ;;  %s209_s0 = sshll.u32 %s315_s11, 4  ;;  %s210_s0 = int_to_ptr.vmem [resolvable:$true] %s209_s0 }
   0x9   :  { %251 = vmatmul.mubr.msk.f32.vlgmr.msra.gmra.mxu0 %vm33_vm1, %v21_v8  ;;  %260 = vmatpush3.msra.mxu1 %v120_v9  ;;  %v114_v15 = vld [vmem:[%s445_s3 + $0x30] sm:$0xff]  ;;  %v113_v16 = vld [vmem:[%s445_s3 + $0x28] sm:$0xff]  ;;  %v112_v17 = vld [vmem:[%s445_s3 + $0x20] sm:$0xff]  ;;  %p296_p1 = scmp.lt.s32.totalorder %s210_s0, %s210_s0 }
   0xa   :  { %261 = vmatprep.subr.mxu1 %v313_v1  ;;  %285 = vmatprep.mubr.msk.f32.mxu1 %vm314_vm0, %v313_v1  ;;  %v111_v18 = vld [vmem:[%s445_s3 + $0x18] sm:$0xff]  ;;  %v110_v19 = vld [vmem:[%s445_s3 + $0x10] sm:$0xff]  ;;  %v109_v20 = vld [vmem:[%s445_s3 + $0x8] sm:$0xff] }
   0xb   :  { %262 = vmatpush3.msra.mxu1 %v119_v10  ;;  %v108_v21 = vld [vmem:[%s445_s3] sm:$0xff]  ;;  %s291_s3 = scalar_lea.vmem %s210_s0, 128 }
   0xc   :  { %263 = vmatprep.subr.mxu1 %v313_v1  ;;  %v217_v22 = vld [vmem:[%s444_s2] ss:$0 sm:$0xff]  ;;  %p292_p0 = scmp.ne.s32.totalorder %s210_s0, %s291_s3  ;;  %p297_p2 = scmp.lt.s32.totalorder %s291_s3, %s291_s3 }
   0xd   :  { %264 = vmatpush3.msra.mxu1 %v118_v11  ;;  %v219_v27 = vld [vmem:[%s446_s4] ss:$0 sm:$0xff] }
   0xe   :  { %265 = vmatprep.subr.mxu1 %v313_v1  ;;  %p298_p3 = por %p297_p2, %p296_p1 }
   0xf   :  { %266 = vmatpush3.msra.mxu1 %v117_v12 }
  0x10   :  { %267 = vmatprep.subr.mxu1 %v313_v1  ;;  %p299_p4 = pnand %p298_p3, %p292_p0 }
  0x11   :  { %268 = vmatpush3.msra.mxu1 %v116_v13 }
  0x12   :  { %269 = vmatprep.subr.mxu1 %v313_v1 }
  0x13   :  { %270 = vmatpush3.msra.mxu1 %v115_v14 }
  0x14   :  { %271 = vmatprep.subr.mxu1 %v313_v1 }
  0x15   :  { %272 = vmatpush3.msra.mxu1 %v114_v15 }
  0x16   :  { %273 = vmatprep.subr.mxu1 %v313_v1 }
  0x17   :  { %274 = vmatpush3.msra.mxu1 %v113_v16 }
  0x18   :  { %275 = vmatprep.subr.mxu1 %v313_v1 }
  0x19   :  { %276 = vmatpush3.msra.mxu1 %v112_v17 }
  0x1a   :  { %277 = vmatprep.subr.mxu1 %v313_v1 }
  0x1b   :  { %278 = vmatpush3.msra.mxu1 %v111_v18 }
  0x1c   :  { %279 = vmatprep.subr.mxu1 %v313_v1 }
  0x1d   :  { %280 = vmatpush3.msra.mxu1 %v110_v19 }
  0x1e   :  { %281 = vmatprep.subr.mxu1 %v313_v1 }
  0x1f   :  { %282 = vmatpush3.msra.mxu1 %v109_v20 }
  0x20   :  { %283 = vmatprep.subr.mxu1 %v313_v1 }
  0x21   :  { %284 = vmatpush3.msra.mxu1 %v108_v21 }
  0xc9   :  { %v103_v23 = vpop.f32.mrf.mxu0 }
  0xca   :  { %v104_v24 = vadd.f32 %v217_v22, %v103_v23 }
  0xcb   :  { %v252_v25 = vpop.f32.mrf.mxu0 }
  0xcc   :  { %v107_v26 = vmax.f32 %v104_v24, 0.0 }
  0xce   :  { %286 = vmatmul.mubr.f32.vlgmr.msra.gmra.mxu1 %v107_v26 }
 0x18e   :  { %v197_v28 = vpop.f32.mrf.mxu1 }
 0x18f   :  { %v198_v29 = vadd.f32 %v219_v27, %v197_v28 }
 0x190   :  { %v287_v30 = vpop.f32.mrf.mxu1 }
 0x191   :  { %202 = vst.msk [vmem:[#allocation2] sm:$0xff] %vm201_vm2, %v198_v29 }
 0x192   :  { %302 = shalt.err (!%p299_p4)
}
 0x193   :  { %212 = dma.vmem_to_hbm [thread:$0]  %s210_s0, 128, %s447_s5, [#allocation3]  }
 0x194   :  { %311 = dma.done.wait [#allocation3], 128  }
 0x195   :  { %312 = vsyncadd [#allocation3], 4294967168 }
 0x196   :  { %216 = vsyncpa [#allocation3], 1 }

</bundles_post_ra>
